<compile_context>
chip_gen: v7x
topology: tpu7x:2x2x1
jax: 0.10.0
libtpu: 0.0.40
codegen_flags: <defaults>
</compile_context>

<pallas_src>
import jax
import jax.numpy as jnp
import numpy as np
from jax.experimental import pallas as pl
from jax.experimental.pallas import tpu as pltpu


def _coattn_kernel(Vt_ref, Q_ref, vmask_ref, qmask_ref,
                   Wb_ref, WvT_ref, WqT_ref, whv_ref, whq_ref,
                   av_ref, aq_ref, v_ref, q_ref):
    """One grid step == one block of BB batch elements.

    Vt_ref : (BB, R, H)   V^T per batch (pre-transposed in the wrapper)
    Q_ref  : (BB, L, H)
    masks  : (BB, R) / (BB, L)
    Wb_ref : (H, H); WvT_ref / WqT_ref : (H, K) (pre-transposed weights)
    whv/whq: (1, K)
    outputs: av (BB, R), aq (BB, L), v/q (BB, H)
    """
    f32 = jnp.float32
    BB, R, H = Vt_ref.shape
    L = Q_ref.shape[1]
    K = WvT_ref.shape[1]

    Vt = Vt_ref[...]
    Qb = Q_ref[...]
    Wb = Wb_ref[...]
    WvT = WvT_ref[...]
    WqT = WqT_ref[...]

    nn_2d = (((1,), (0,)), ((), ()))   # contract lhs dim-1 with rhs dim-0
    nt_2d = (((1,), (1,)), ((), ()))   # contract lhs dim-1 with rhs dim-1

    # ---- Fold the batch into the row dimension: each weight projection is a
    #      single GEMM over all BB batch elements (R, L multiples of 8 keep
    #      these reshapes layout-free).
    Vflat = Vt.reshape(BB * R, H)
    Qflat = Qb.reshape(BB * L, H)

    WvVt = jax.lax.dot_general(Vflat, WvT, nn_2d, preferred_element_type=f32)  # (BB*R, K) = (W_v V_b)^T
    WqQ = jax.lax.dot_general(Qflat, WqT, nn_2d, preferred_element_type=f32)   # (BB*L, K) = (W_q Q_b^T)^T
    WvVt3 = WvVt.reshape(BB, R, K)
    WqQ3 = WqQ.reshape(BB, L, K)

    # ---- C = Q (W_b V): pick the cheaper association (static shapes).
    #      Both C (L,R) and Ct (R,L) are built with MXU-friendly NT
    #      contractions over the shared H axis, so no operand is ever
    #      transposed in-kernel.
    if L <= R:
        QWb = jax.lax.dot_general(Qflat, Wb, nn_2d, preferred_element_type=f32)   # (BB*L, H) = Q_b W_b
        QWb3 = QWb.reshape(BB, L, H)
        C = jnp.einsum('blh,brh->blr', QWb3, Vt, preferred_element_type=f32)      # (BB, L, R)
        Ct = jnp.einsum('brh,blh->brl', Vt, QWb3, preferred_element_type=f32)     # (BB, R, L)
    else:
        WbVt = jax.lax.dot_general(Vflat, Wb, nt_2d, preferred_element_type=f32)  # (BB*R, H) = (W_b V_b)^T
        WbVt3 = WbVt.reshape(BB, R, H)
        C = jnp.einsum('blh,brh->blr', Qb, WbVt3, preferred_element_type=f32)
        Ct = jnp.einsum('brh,blh->brl', WbVt3, Qb, preferred_element_type=f32)

    # ---- H_v^T = tanh((W_v V)^T + C^T (W_q Q^T)^T)  -> (BB, R, K)
    #      H_q^T = tanh((W_q Q^T)^T + C   (W_v V)^T)  -> (BB, L, K)
    #      (tanh inputs stay f32 -- matmuls accumulate in f32; tanh goes to
    #       the EUP slot, free next to MXU work.)
    Hv_t = jnp.tanh(WvVt3 + jnp.einsum('brl,blk->brk', Ct, WqQ3,
                                       preferred_element_type=f32))
    Hq_t = jnp.tanh(WqQ3 + jnp.einsum('blr,brk->blk', C, WvVt3,
                                      preferred_element_type=f32))

    # ---- scores = w_hv^T H_v / w_hq^T H_q as a lane-reduction over K
    #      (VPU multiply + XLU reduce; both slots have slack next to the MXU).
    whv3 = whv_ref[...].reshape(1, 1, K).astype(f32)
    whq3 = whq_ref[...].reshape(1, 1, K).astype(f32)
    scores_v = jnp.sum(Hv_t * whv3, axis=-1)   # (BB, R)
    scores_q = jnp.sum(Hq_t * whq3, axis=-1)   # (BB, L)

    def _softmax(x):
        m = jnp.max(x, axis=-1, keepdims=True)
        e = jnp.exp(x - m)
        s = jnp.sum(e, axis=-1, keepdims=True)
        # approx=False keeps the self-check tight; approx=True puts the
        # reciprocal on the EUP slot if the looser accuracy is acceptable.
        return e * pl.reciprocal(s, approx=False)

    a_v = _softmax(scores_v)
    a_q = _softmax(scores_q)

    # masked_softmax applied on top of the already-softmaxed scores
    # (matches the PyTorch module exactly).
    neg_inf = jnp.float32(-jnp.inf)
    masked_a_v = _softmax(jnp.where(vmask_ref[...] == 0, neg_inf, a_v))   # (BB, R)
    masked_a_q = _softmax(jnp.where(qmask_ref[...] == 0, neg_inf, a_q))   # (BB, L)

    av_ref[...] = masked_a_v
    aq_ref[...] = masked_a_q

    # v = masked_a_v @ V^T, q = masked_a_q @ Q  (Vt already holds V^T).
    # Computed as batched (1,R)x(R,H) NN matmuls; the (BB,1,H)->(BB,H)
    # reshape is layout-free and keeps the stores 2D lane-dense.
    v3 = jnp.einsum('bxr,brh->bxh', masked_a_v[:, None, :], Vt,
                    preferred_element_type=f32)
    q3 = jnp.einsum('bxl,blh->bxh', masked_a_q[:, None, :], Qb,
                    preferred_element_type=f32)
    v_ref[...] = v3.reshape(BB, H).astype(v_ref.dtype)
    q_ref[...] = q3.reshape(BB, H).astype(q_ref.dtype)


def parallel_co_attention(V, Q, V_masks, Q_masks, W_b, W_v, W_q, w_hv, w_hq,
                          *, batch_block=None, operand_dtype=None):
    """Pallas wrapper reproducing ParallelCoAttentionNetwork.forward.

    V: (B, H, R), Q: (B, L, H), V_masks: (B, R), Q_masks: (B, L)
    Returns (masked_a_v (B,1,R), masked_a_q (B,1,L), v (B,H), q (B,H)).

    batch_block: batches per grid step (default: all of B in one step).
                 If < B it must divide B and be a multiple of 8 (TPU tiling).
    operand_dtype: optional cast for matmul operands (e.g. jnp.bfloat16 on
                 v6e/v7x); accumulation / tanh / softmax remain f32.
    """
    B, H, R = V.shape
    _, L, _ = Q.shape
    K = W_v.shape[0]

    BB = B if batch_block is None else int(batch_block)
    if B % BB != 0:
        raise ValueError(f"batch {B} must be divisible by batch_block {BB}")
    if BB != B and BB % 8 != 0:
        raise ValueError("batch_block must equal B or be a multiple of 8")
    n_blocks = B // BB

    # Layout plumbing done once in the wrapper (outside the kernel):
    #  * V^T per batch so the shared H axis sits on lanes for every GEMM,
    #  * weights pre-transposed so the folded projections are plain NN GEMMs,
    #  * optional bf16 cast of matmul operands.
    cdt = operand_dtype if operand_dtype is not None else V.dtype
    Vt = jnp.transpose(V, (0, 2, 1)).astype(cdt)     # (B, R, H)
    Qc = Q.astype(cdt)                               # (B, L, H)
    Wb = W_b.astype(cdt)                             # (H, H)
    WvT = W_v.T.astype(cdt)                          # (H, K)
    WqT = W_q.T.astype(cdt)                          # (H, K)
    whv_t = w_hv.reshape(1, K).astype(jnp.float32)   # (1, K)
    whq_t = w_hq.reshape(1, K).astype(jnp.float32)   # (1, K)
    vmask = V_masks.astype(jnp.float32)              # (B, R)
    qmask = Q_masks.astype(jnp.float32)              # (B, L)

    out_shapes = (
        jax.ShapeDtypeStruct((B, R), jnp.float32),   # masked_a_v (lane-dense slab)
        jax.ShapeDtypeStruct((B, L), jnp.float32),   # masked_a_q
        jax.ShapeDtypeStruct((B, H), jnp.float32),   # v
        jax.ShapeDtypeStruct((B, H), jnp.float32),   # q
    )

    # NOTE: weights have a constant index_map; at toy sizes the extra pipeline
    # buffer is irrelevant (grid is usually a single step). For large H on
    # v7x (64 MiB VMEM) consider pipeline_mode=pl.Buffered(1) on the weight
    # specs / an explicit vmem_limit_bytes.
    grid_spec = pltpu.PrefetchScalarGridSpec(
        num_scalar_prefetch=0,
        grid=(n_blocks,),
        in_specs=[
            pl.BlockSpec((BB, R, H), lambda i: (i, 0, 0)),   # V^T
            pl.BlockSpec((BB, L, H), lambda i: (i, 0, 0)),   # Q
            pl.BlockSpec((BB, R), lambda i: (i, 0)),         # V mask
            pl.BlockSpec((BB, L), lambda i: (i, 0)),         # Q mask
            pl.BlockSpec((H, H), lambda i: (0, 0)),          # W_b
            pl.BlockSpec((H, K), lambda i: (0, 0)),          # W_v^T
            pl.BlockSpec((H, K), lambda i: (0, 0)),          # W_q^T
            pl.BlockSpec((1, K), lambda i: (0, 0)),          # w_hv^T
            pl.BlockSpec((1, K), lambda i: (0, 0)),          # w_hq^T
        ],
        out_specs=[
            pl.BlockSpec((BB, R), lambda i: (i, 0)),
            pl.BlockSpec((BB, L), lambda i: (i, 0)),
            pl.BlockSpec((BB, H), lambda i: (i, 0)),
            pl.BlockSpec((BB, H), lambda i: (i, 0)),
        ],
    )

    masked_a_v, masked_a_q, v2, q2 = pl.pallas_call(
        _coattn_kernel,
        out_shape=out_shapes,
        grid_spec=grid_spec,
        compiler_params=pltpu.CompilerParams(
            dimension_semantics=("parallel",)),
    )(Vt, Qc, vmask, qmask, Wb, WvT, WqT, whv_t, whq_t)

    # Match the module's returned shapes: (B,1,R), (B,1,L), (B,H), (B,H).
    # (torch.squeeze would also drop the batch dim when B == 1; we keep (B,H).)
    return masked_a_v[:, None, :], masked_a_q[:, None, :], v2, q2


def _reference(V, Q, V_masks, Q_masks, W_b, W_v, W_q, w_hv, w_hq):
    """Pure-JAX reference mirroring the PyTorch math, for verification."""
    WbV = jnp.einsum('hk,bkr->bhr', W_b, V)
    C = jnp.einsum('blh,bhr->blr', Q, WbV)
    WvV = jnp.einsum('kh,bhr->bkr', W_v, V)
    WqQt = jnp.einsum('kh,blh->bkl', W_q, Q)
    H_v = jnp.tanh(WvV + jnp.einsum('bkl,blr->bkr', WqQt, C))
    H_q = jnp.tanh(WqQt + jnp.einsum('bkr,blr->bkl', WvV, C))
    a_v = jax.nn.softmax(jnp.einsum('k,bkr->br', w_hv[:, 0], H_v), axis=-1)
    a_q = jax.nn.softmax(jnp.einsum('k,bkl->bl', w_hq[:, 0], H_q), axis=-1)
    mav = jax.nn.softmax(jnp.where(V_masks == 0, -jnp.inf, a_v), axis=-1)
    maq = jax.nn.softmax(jnp.where(Q_masks == 0, -jnp.inf, a_q), axis=-1)
    v = jnp.einsum('br,bhr->bh', mav, V)
    q = jnp.einsum('bl,blh->bh', maq, Q)
    return mav[:, None, :], maq[:, None, :], v, q


if __name__ == "__main__":
    # batch, hidden_dim, co_attention_dim, region_num, seq_len
    B, H, K, R, L = 2, 32, 16, 16, 8

    key = jax.random.PRNGKey(0)
    kV, kQ, kWb, kWv, kWq, khv, khq = jax.random.split(key, 7)

    # Activations scaled so tanh is not fully saturated: keeps the f32
    # comparison against the differently-associated reference well conditioned.
    V = 0.1 * jax.random.normal(kV, (B, H, R), dtype=jnp.float32)
    Q = 0.1 * jax.random.normal(kQ, (B, L, H), dtype=jnp.float32)

    V_masks = jnp.ones((B, R), dtype=jnp.float32).at[0, R - 3:].set(0.0)
    Q_masks = jnp.ones((B, L), dtype=jnp.float32).at[1, L - 2:].set(0.0)

    # Parameters with the same shapes as the nn.Module __init__ (randn).
    W_b = jax.random.normal(kWb, (H, H), dtype=jnp.float32)
    W_v = jax.random.normal(kWv, (K, H), dtype=jnp.float32)
    W_q = jax.random.normal(kWq, (K, H), dtype=jnp.float32)
    w_hv = jax.random.normal(khv, (K, 1), dtype=jnp.float32)
    w_hq = jax.random.normal(khq, (K, 1), dtype=jnp.float32)

    outs = parallel_co_attention(V, Q, V_masks, Q_masks,
                                 W_b, W_v, W_q, w_hv, w_hq)
    outs = jax.block_until_ready(outs)

    refs = _reference(V, Q, V_masks, Q_masks, W_b, W_v, W_q, w_hv, w_hq)
    for o, r in zip(outs, refs):
        # rtol accounts for the (mathematically identical) matmul
        # re-association / orientation differences vs. the reference.
        np.testing.assert_allclose(np.asarray(o), np.asarray(r),
                                   rtol=5e-4, atol=1e-5)

    print("KERNEL_OK")
</pallas_src>

<mosaic_0001>
module attributes {stable_mosaic.version = 11 : i64} {
  func.func @_coattn_kernel(%arg0: i32, %arg1: memref<2x16x32xf32, #tpu.memory_space<vmem>>, %arg2: memref<2x8x32xf32, #tpu.memory_space<vmem>>, %arg3: memref<2x16xf32, #tpu.memory_space<vmem>>, %arg4: memref<2x8xf32, #tpu.memory_space<vmem>>, %arg5: memref<32x32xf32, #tpu.memory_space<vmem>>, %arg6: memref<32x16xf32, #tpu.memory_space<vmem>>, %arg7: memref<32x16xf32, #tpu.memory_space<vmem>>, %arg8: memref<1x16xf32, #tpu.memory_space<vmem>>, %arg9: memref<1x16xf32, #tpu.memory_space<vmem>>, %arg10: memref<2x16xf32, #tpu.memory_space<vmem>>, %arg11: memref<2x8xf32, #tpu.memory_space<vmem>>, %arg12: memref<2x32xf32, #tpu.memory_space<vmem>>, %arg13: memref<2x32xf32, #tpu.memory_space<vmem>>) attributes {dimension_semantics = [#tpu.dimension_semantics<parallel>], iteration_bounds = array<i64: 1>, scalar_prefetch = 0 : i64, scratch_operands = 0 : i64, tpu.core_type = #tpu.core_type<tc>, window_params = [{transform_indices = @transform_0, window_bounds = array<i64: 2, 16, 32>}, {transform_indices = @transform_1, window_bounds = array<i64: 2, 8, 32>}, {transform_indices = @transform_2, window_bounds = array<i64: 2, 16>}, {transform_indices = @transform_3, window_bounds = array<i64: 2, 8>}, {pipeline_mode = #tpu.pipeline_mode<synchronous>, transform_indices = @transform_4, window_bounds = array<i64: 32, 32>}, {pipeline_mode = #tpu.pipeline_mode<synchronous>, transform_indices = @transform_5, window_bounds = array<i64: 32, 16>}, {pipeline_mode = #tpu.pipeline_mode<synchronous>, transform_indices = @transform_6, window_bounds = array<i64: 32, 16>}, {pipeline_mode = #tpu.pipeline_mode<synchronous>, transform_indices = @transform_7, window_bounds = array<i64: 1, 16>}, {pipeline_mode = #tpu.pipeline_mode<synchronous>, transform_indices = @transform_8, window_bounds = array<i64: 1, 16>}, {transform_indices = @transform_9, window_bounds = array<i64: 2, 16>}, {transform_indices = @transform_10, window_bounds = array<i64: 2, 8>}, {transform_indices = @transform_11, window_bounds = array<i64: 2, 32>}, {transform_indices = @transform_12, window_bounds = array<i64: 2, 32>}]} {
    %c0 = arith.constant 0 : index
    %c0_0 = arith.constant 0 : index
    %c0_1 = arith.constant 0 : index
    %0 = vector.load %arg1[%c0, %c0_0, %c0_1] : memref<2x16x32xf32, #tpu.memory_space<vmem>>, vector<2x16x32xf32>
    %c0_2 = arith.constant 0 : index
    %c0_3 = arith.constant 0 : index
    %c0_4 = arith.constant 0 : index
    %1 = vector.load %arg2[%c0_2, %c0_3, %c0_4] : memref<2x8x32xf32, #tpu.memory_space<vmem>>, vector<2x8x32xf32>
    %c0_5 = arith.constant 0 : index
    %c0_6 = arith.constant 0 : index
    %2 = vector.load %arg5[%c0_5, %c0_6] : memref<32x32xf32, #tpu.memory_space<vmem>>, vector<32x32xf32>
    %c0_7 = arith.constant 0 : index
    %c0_8 = arith.constant 0 : index
    %3 = vector.load %arg6[%c0_7, %c0_8] : memref<32x16xf32, #tpu.memory_space<vmem>>, vector<32x16xf32>
    %c0_9 = arith.constant 0 : index
    %c0_10 = arith.constant 0 : index
    %4 = vector.load %arg7[%c0_9, %c0_10] : memref<32x16xf32, #tpu.memory_space<vmem>>, vector<32x16xf32>
    %5 = vector.shape_cast %0 : vector<2x16x32xf32> to vector<32x32xf32>
    %6 = vector.shape_cast %1 : vector<2x8x32xf32> to vector<16x32xf32>
    %cst = arith.constant dense<0.000000e+00> : vector<32x16xf32>
    %7 = tpu.matmul %5, %3, %cst {dimension_numbers = #tpu.dot_dimension_numbers<[1], [0], [0], [1], [0, 0, 1, 1], [], []>} : vector<32x32xf32>, vector<32x16xf32>, vector<32x16xf32> -> vector<32x16xf32>
    %cst_11 = arith.constant dense<0.000000e+00> : vector<16x16xf32>
    %8 = tpu.matmul %6, %4, %cst_11 {dimension_numbers = #tpu.dot_dimension_numbers<[1], [0], [0], [1], [0, 0, 1, 1], [], []>} : vector<16x32xf32>, vector<32x16xf32>, vector<16x16xf32> -> vector<16x16xf32>
    %9 = vector.shape_cast %7 : vector<32x16xf32> to vector<2x16x16xf32>
    %10 = vector.shape_cast %8 : vector<16x16xf32> to vector<2x8x16xf32>
    %cst_12 = arith.constant dense<0.000000e+00> : vector<16x32xf32>
    %11 = tpu.matmul %6, %2, %cst_12 {dimension_numbers = #tpu.dot_dimension_numbers<[1], [0], [0], [1], [0, 0, 1, 1], [], []>} : vector<16x32xf32>, vector<32x32xf32>, vector<16x32xf32> -> vector<16x32xf32>
    %12 = vector.shape_cast %11 : vector<16x32xf32> to vector<2x8x32xf32>
    "tpu.trace_start"() <{level = 10 : i32, message = "blh,brh->blr"}> : () -> ()
    %cst_13 = arith.constant dense<0.000000e+00> : vector<2x8x16xf32>
    %13 = tpu.matmul %12, %0, %cst_13 {dimension_numbers = #tpu.dot_dimension_numbers<[2], [2], [1], [1], [0, 0, 0, 1, 1, 1], [0], [0]>} : vector<2x8x32xf32>, vector<2x16x32xf32>, vector<2x8x16xf32> -> vector<2x8x16xf32>
    "tpu.trace_stop"() : () -> ()
    "tpu.trace_start"() <{level = 10 : i32, message = "brh,blh->brl"}> : () -> ()
    %cst_14 = arith.constant dense<0.000000e+00> : vector<2x16x8xf32>
    %14 = tpu.matmul %0, %12, %cst_14 {dimension_numbers = #tpu.dot_dimension_numbers<[2], [2], [1], [1], [0, 0, 0, 1, 1, 1], [0], [0]>} : vector<2x16x32xf32>, vector<2x8x32xf32>, vector<2x16x8xf32> -> vector<2x16x8xf32>
    "tpu.trace_stop"() : () -> ()
    "tpu.trace_start"() <{level = 10 : i32, message = "brl,blk->brk"}> : () -> ()
    %cst_15 = arith.constant dense<0.000000e+00> : vector<2x16x16xf32>
    %15 = tpu.matmul %14, %10, %cst_15 {dimension_numbers = #tpu.dot_dimension_numbers<[2], [1], [1], [2], [0, 0, 0, 1, 1, 2], [0], [0]>} : vector<2x16x8xf32>, vector<2x8x16xf32>, vector<2x16x16xf32> -> vector<2x16x16xf32>
    "tpu.trace_stop"() : () -> ()
    %16 = arith.addf %9, %15 : vector<2x16x16xf32>
    %17 = math.tanh %16 : vector<2x16x16xf32>
    "tpu.trace_start"() <{level = 10 : i32, message = "blr,brk->blk"}> : () -> ()
    %cst_16 = arith.constant dense<0.000000e+00> : vector<2x8x16xf32>
    %18 = tpu.matmul %13, %9, %cst_16 {dimension_numbers = #tpu.dot_dimension_numbers<[2], [1], [1], [2], [0, 0, 0, 1, 1, 2], [0], [0]>} : vector<2x8x16xf32>, vector<2x16x16xf32>, vector<2x8x16xf32> -> vector<2x8x16xf32>
    "tpu.trace_stop"() : () -> ()
    %19 = arith.addf %10, %18 : vector<2x8x16xf32>
    %20 = math.tanh %19 : vector<2x8x16xf32>
    %c0_17 = arith.constant 0 : index
    %c0_18 = arith.constant 0 : index
    %21 = vector.load %arg8[%c0_17, %c0_18] : memref<1x16xf32, #tpu.memory_space<vmem>>, vector<1x16xf32>
    %22 = vector.shape_cast %21 : vector<1x16xf32> to vector<1x1x16xf32>
    %c0_19 = arith.constant 0 : index
    %c0_20 = arith.constant 0 : index
    %23 = vector.load %arg9[%c0_19, %c0_20] : memref<1x16xf32, #tpu.memory_space<vmem>>, vector<1x16xf32>
    %24 = vector.shape_cast %23 : vector<1x16xf32> to vector<1x1x16xf32>
    %25 = vector.broadcast %22 : vector<1x1x16xf32> to vector<2x16x16xf32>
    %26 = arith.mulf %17, %25 : vector<2x16x16xf32>
    %cst_21 = arith.constant dense<0.000000e+00> : vector<2x16xf32>
    %27 = vector.multi_reduction <add>, %26, %cst_21 [2] : vector<2x16x16xf32> to vector<2x16xf32>
    %28 = vector.broadcast %24 : vector<1x1x16xf32> to vector<2x8x16xf32>
    %29 = arith.mulf %20, %28 : vector<2x8x16xf32>
    %cst_22 = arith.constant dense<0.000000e+00> : vector<2x8xf32>
    %30 = vector.multi_reduction <add>, %29, %cst_22 [2] : vector<2x8x16xf32> to vector<2x8xf32>
    %cst_23 = arith.constant dense<0xFF800000> : vector<2xf32>
    %31 = vector.multi_reduction <maximumf>, %27, %cst_23 [1] : vector<2x16xf32> to vector<2xf32>
    %32 = vector.shape_cast %31 : vector<2xf32> to vector<2x1xf32>
    %33 = vector.broadcast %32 : vector<2x1xf32> to vector<2x16xf32>
    %34 = arith.subf %27, %33 : vector<2x16xf32>
    %35 = math.exp %34 : vector<2x16xf32>
    %cst_24 = arith.constant dense<0.000000e+00> : vector<2xf32>
    %36 = vector.multi_reduction <add>, %35, %cst_24 [1] : vector<2x16xf32> to vector<2xf32>
    %37 = vector.shape_cast %36 : vector<2xf32> to vector<2x1xf32>
    %38 = tpu.reciprocal %37 : vector<2x1xf32> -> vector<2x1xf32>
    %39 = vector.broadcast %38 : vector<2x1xf32> to vector<2x16xf32>
    %40 = arith.mulf %35, %39 : vector<2x16xf32>
    %cst_25 = arith.constant dense<0xFF800000> : vector<2xf32>
    %41 = vector.multi_reduction <maximumf>, %30, %cst_25 [1] : vector<2x8xf32> to vector<2xf32>
    %42 = vector.shape_cast %41 : vector<2xf32> to vector<2x1xf32>
    %43 = vector.broadcast %42 : vector<2x1xf32> to vector<2x8xf32>
    %44 = arith.subf %30, %43 : vector<2x8xf32>
    %45 = math.exp %44 : vector<2x8xf32>
    %cst_26 = arith.constant dense<0.000000e+00> : vector<2xf32>
    %46 = vector.multi_reduction <add>, %45, %cst_26 [1] : vector<2x8xf32> to vector<2xf32>
    %47 = vector.shape_cast %46 : vector<2xf32> to vector<2x1xf32>
    %48 = tpu.reciprocal %47 : vector<2x1xf32> -> vector<2x1xf32>
    %49 = vector.broadcast %48 : vector<2x1xf32> to vector<2x8xf32>
    %50 = arith.mulf %45, %49 : vector<2x8xf32>
    %c0_27 = arith.constant 0 : index
    %c0_28 = arith.constant 0 : index
    %51 = vector.load %arg3[%c0_27, %c0_28] : memref<2x16xf32, #tpu.memory_space<vmem>>, vector<2x16xf32>
    %cst_29 = arith.constant 0.000000e+00 : f32
    %52 = vector.broadcast %cst_29 : f32 to vector<2x16xf32>
    %53 = arith.cmpf oeq, %51, %52 : vector<2x16xf32>
    %cst_30 = arith.constant 0xFF800000 : f32
    %54 = vector.broadcast %cst_30 : f32 to vector<2x16xf32>
    %55 = arith.select %53, %54, %40 : vector<2x16xi1>, vector<2x16xf32>
    %cst_31 = arith.constant dense<0xFF800000> : vector<2xf32>
    %56 = vector.multi_reduction <maximumf>, %55, %cst_31 [1] : vector<2x16xf32> to vector<2xf32>
    %57 = vector.shape_cast %56 : vector<2xf32> to vector<2x1xf32>
    %58 = vector.broadcast %57 : vector<2x1xf32> to vector<2x16xf32>
    %59 = arith.subf %55, %58 : vector<2x16xf32>
    %60 = math.exp %59 : vector<2x16xf32>
    %cst_32 = arith.constant dense<0.000000e+00> : vector<2xf32>
    %61 = vector.multi_reduction <add>, %60, %cst_32 [1] : vector<2x16xf32> to vector<2xf32>
    %62 = vector.shape_cast %61 : vector<2xf32> to vector<2x1xf32>
    %63 = tpu.reciprocal %62 : vector<2x1xf32> -> vector<2x1xf32>
    %64 = vector.broadcast %63 : vector<2x1xf32> to vector<2x16xf32>
    %65 = arith.mulf %60, %64 : vector<2x16xf32>
    %c0_33 = arith.constant 0 : index
    %c0_34 = arith.constant 0 : index
    %66 = vector.load %arg4[%c0_33, %c0_34] : memref<2x8xf32, #tpu.memory_space<vmem>>, vector<2x8xf32>
    %cst_35 = arith.constant 0.000000e+00 : f32
    %67 = vector.broadcast %cst_35 : f32 to vector<2x8xf32>
    %68 = arith.cmpf oeq, %66, %67 : vector<2x8xf32>
    %cst_36 = arith.constant 0xFF800000 : f32
    %69 = vector.broadcast %cst_36 : f32 to vector<2x8xf32>
    %70 = arith.select %68, %69, %50 : vector<2x8xi1>, vector<2x8xf32>
    %cst_37 = arith.constant dense<0xFF800000> : vector<2xf32>
    %71 = vector.multi_reduction <maximumf>, %70, %cst_37 [1] : vector<2x8xf32> to vector<2xf32>
    %72 = vector.shape_cast %71 : vector<2xf32> to vector<2x1xf32>
    %73 = vector.broadcast %72 : vector<2x1xf32> to vector<2x8xf32>
    %74 = arith.subf %70, %73 : vector<2x8xf32>
    %75 = math.exp %74 : vector<2x8xf32>
    %cst_38 = arith.constant dense<0.000000e+00> : vector<2xf32>
    %76 = vector.multi_reduction <add>, %75, %cst_38 [1] : vector<2x8xf32> to vector<2xf32>
    %77 = vector.shape_cast %76 : vector<2xf32> to vector<2x1xf32>
    %78 = tpu.reciprocal %77 : vector<2x1xf32> -> vector<2x1xf32>
    %79 = vector.broadcast %78 : vector<2x1xf32> to vector<2x8xf32>
    %80 = arith.mulf %75, %79 : vector<2x8xf32>
    %c0_39 = arith.constant 0 : index
    %c0_40 = arith.constant 0 : index
    %81 = vector.load %arg10[%c0_39, %c0_40] : memref<2x16xf32, #tpu.memory_space<vmem>>, vector<2x16xf32>
    tpu.vector_store %arg10[%c0_39, %c0_40], %65 {strides = array<i32>} : memref<2x16xf32, #tpu.memory_space<vmem>>, vector<2x16xf32>,
    %c0_41 = arith.constant 0 : index
    %c0_42 = arith.constant 0 : index
    %82 = vector.load %arg11[%c0_41, %c0_42] : memref<2x8xf32, #tpu.memory_space<vmem>>, vector<2x8xf32>
    tpu.vector_store %arg11[%c0_41, %c0_42], %80 {strides = array<i32>} : memref<2x8xf32, #tpu.memory_space<vmem>>, vector<2x8xf32>,
    %83 = vector.shape_cast %65 : vector<2x16xf32> to vector<2x1x16xf32>
    "tpu.trace_start"() <{level = 10 : i32, message = "bxr,brh->bxh"}> : () -> ()
    %cst_43 = arith.constant dense<0.000000e+00> : vector<2x1x32xf32>
    %84 = tpu.matmul %83, %0, %cst_43 {dimension_numbers = #tpu.dot_dimension_numbers<[2], [1], [1], [2], [0, 0, 0, 1, 1, 2], [0], [0]>} : vector<2x1x16xf32>, vector<2x16x32xf32>, vector<2x1x32xf32> -> vector<2x1x32xf32>
    "tpu.trace_stop"() : () -> ()
    %85 = vector.shape_cast %80 : vector<2x8xf32> to vector<2x1x8xf32>
    "tpu.trace_start"() <{level = 10 : i32, message = "bxl,blh->bxh"}> : () -> ()
    %cst_44 = arith.constant dense<0.000000e+00> : vector<2x1x32xf32>
    %86 = tpu.matmul %85, %1, %cst_44 {dimension_numbers = #tpu.dot_dimension_numbers<[2], [1], [1], [2], [0, 0, 0, 1, 1, 2], [0], [0]>} : vector<2x1x8xf32>, vector<2x8x32xf32>, vector<2x1x32xf32> -> vector<2x1x32xf32>
    "tpu.trace_stop"() : () -> ()
    %87 = vector.shape_cast %84 : vector<2x1x32xf32> to vector<2x32xf32>
    %c0_45 = arith.constant 0 : index
    %c0_46 = arith.constant 0 : index
    %88 = vector.load %arg12[%c0_45, %c0_46] : memref<2x32xf32, #tpu.memory_space<vmem>>, vector<2x32xf32>
    tpu.vector_store %arg12[%c0_45, %c0_46], %87 {strides = array<i32>} : memref<2x32xf32, #tpu.memory_space<vmem>>, vector<2x32xf32>,
    %89 = vector.shape_cast %86 : vector<2x1x32xf32> to vector<2x32xf32>
    %c0_47 = arith.constant 0 : index
    %c0_48 = arith.constant 0 : index
    %90 = vector.load %arg13[%c0_47, %c0_48] : memref<2x32xf32, #tpu.memory_space<vmem>>, vector<2x32xf32>
    tpu.vector_store %arg13[%c0_47, %c0_48], %89 {strides = array<i32>} : memref<2x32xf32, #tpu.memory_space<vmem>>, vector<2x32xf32>,
    return
  }
  func.func @transform_0(%arg0: i32) -> (i32, i32, i32) {
    %c0_i32 = arith.constant 0 : i32
    %c0_i32_0 = arith.constant 0 : i32
    %c0_i32_1 = arith.constant 0 : i32
    return %arg0, %c0_i32, %c0_i32_0 : i32, i32, i32
  }
  func.func @transform_1(%arg0: i32) -> (i32, i32, i32) {
    %c0_i32 = arith.constant 0 : i32
    %c0_i32_0 = arith.constant 0 : i32
    %c0_i32_1 = arith.constant 0 : i32
    return %arg0, %c0_i32, %c0_i32_0 : i32, i32, i32
  }
  func.func @transform_2(%arg0: i32) -> (i32, i32) {
    %c0_i32 = arith.constant 0 : i32
    %c0_i32_0 = arith.constant 0 : i32
    return %arg0, %c0_i32 : i32, i32
  }
  func.func @transform_3(%arg0: i32) -> (i32, i32) {
    %c0_i32 = arith.constant 0 : i32
    %c0_i32_0 = arith.constant 0 : i32
    return %arg0, %c0_i32 : i32, i32
  }
  func.func @transform_4(%arg0: i32) -> (i32, i32) {
    %c0_i32 = arith.constant 0 : i32
    %c0_i32_0 = arith.constant 0 : i32
    %c0_i32_1 = arith.constant 0 : i32
    return %c0_i32, %c0_i32_0 : i32, i32
  }
  func.func @transform_5(%arg0: i32) -> (i32, i32) {
    %c0_i32 = arith.constant 0 : i32
    %c0_i32_0 = arith.constant 0 : i32
    %c0_i32_1 = arith.constant 0 : i32
    return %c0_i32, %c0_i32_0 : i32, i32
  }
  func.func @transform_6(%arg0: i32) -> (i32, i32) {
    %c0_i32 = arith.constant 0 : i32
    %c0_i32_0 = arith.constant 0 : i32
    %c0_i32_1 = arith.constant 0 : i32
    return %c0_i32, %c0_i32_0 : i32, i32
  }
  func.func @transform_7(%arg0: i32) -> (i32, i32) {
    %c0_i32 = arith.constant 0 : i32
    %c0_i32_0 = arith.constant 0 : i32
    %c0_i32_1 = arith.constant 0 : i32
    return %c0_i32, %c0_i32_0 : i32, i32
  }
  func.func @transform_8(%arg0: i32) -> (i32, i32) {
    %c0_i32 = arith.constant 0 : i32
    %c0_i32_0 = arith.constant 0 : i32
    %c0_i32_1 = arith.constant 0 : i32
    return %c0_i32, %c0_i32_0 : i32, i32
  }
  func.func @transform_9(%arg0: i32) -> (i32, i32) {
    %c0_i32 = arith.constant 0 : i32
    %c0_i32_0 = arith.constant 0 : i32
    return %arg0, %c0_i32 : i32, i32
  }
  func.func @transform_10(%arg0: i32) -> (i32, i32) {
    %c0_i32 = arith.constant 0 : i32
    %c0_i32_0 = arith.constant 0 : i32
    return %arg0, %c0_i32 : i32, i32
  }
  func.func @transform_11(%arg0: i32) -> (i32, i32) {
    %c0_i32 = arith.constant 0 : i32
    %c0_i32_0 = arith.constant 0 : i32
    return %arg0, %c0_i32 : i32, i32
  }
  func.func @transform_12(%arg0: i32) -> (i32, i32) {
    %c0_i32 = arith.constant 0 : i32
    %c0_i32_0 = arith.constant 0 : i32
    return %arg0, %c0_i32 : i32, i32
  }
}

</mosaic_0001>

<bundles_post_ra>
// kernel: tpu_custom_call.1
= control target key start
LH: loop header
LB: loop body
LE: loop exit
PB: predicated region body
PF: predicated region fallthrough
CT: control target
= control target key end

     0   :  { %18 = vsyncpa [#allocation3], 0  ;;  %s2388_s0 = inlined_call_operand.vmem [shape: f32[2,16,32], index: 0, kind: input, shape index: {}]   ;;  %s2389_s1 = inlined_call_operand.vmem [shape: f32[2,8,32], index: 1, kind: input, shape index: {}]   ;;  %s2390_s2 = inlined_call_operand.vmem [shape: f32[2,16], index: 2, kind: input, shape index: {}]   ;;  %s2391_s3 = inlined_call_operand.hbm [shape: f32[2,8], index: 3, kind: input, shape index: {}]   ;;  %s2392_s4 = inlined_call_operand.vmem [shape: f32[32,32], index: 4, kind: input, shape index: {}]   ;;  %s2393_s5 = inlined_call_operand.vmem [shape: f32[32,16], index: 5, kind: input, shape index: {}]   ;;  %s2394_s6 = inlined_call_operand.vmem [shape: f32[32,16], index: 6, kind: input, shape index: {}]   ;;  %s2395_s7 = inlined_call_operand.vmem [shape: f32[1,16], index: 7, kind: input, shape index: {}]   ;;  %s2396_s8 = inlined_call_operand.vmem [shape: f32[1,16], index: 8, kind: input, shape index: {}]   ;;  %s2397_s9 = inlined_call_operand.hbm [shape: f32[2,16], index: 9, kind: output, shape index: {0}]   ;;  %s2398_s10 = inlined_call_operand.hbm [shape: f32[2,8], index: 10, kind: output, shape index: {1}]   ;;  %s2399_s11 = inlined_call_operand.hbm [shape: f32[2,32], index: 11, kind: output, shape index: {2}]   ;;  %s2400_s12 = inlined_call_operand.hbm [shape: f32[2,32], index: 12, kind: output, shape index: {3}]  }
   0x1   :  { %19 = vsyncpa [#allocation4], 0 }
   0x2   :  { %20 = vsyncpa [#allocation7], 0 }
   0x3   :  { %21 = vsyncpa [#allocation10], 0  ;;  %s2049_s21 = smov [#allocation2]   ;;  %s1931_s25 = scalar_lea.hbm %s2391_s3, 32 }
   0x4   :  { %s34_s22 = sshll.u32 %s2049_s21, 4  ;;  %p1932_p0 = scmp.ne.s32.totalorder %s2391_s3, %s1931_s25  ;;  %s35_s22 = int_to_ptr.vmem [resolvable:$true] %s34_s22 }
   0x5   :  { %p1935_p1 = scmp.lt.u32.totalorder %s1931_s25, %s2391_s3 }
   0x7   :  { %p1937_p2 = pnand %p1935_p1, %p1932_p0 }
   0x9   :  { %1940 = shalt.err (!%p1937_p2)
}
   0xa   :  { %s1941_s30 = scalar_lea.vmem %s35_s22, 32  ;;  %p1946_p4 = scmp.lt.s32.totalorder %s35_s22, %s35_s22 }
   0xb   :  { %p1942_p3 = scmp.ne.s32.totalorder %s35_s22, %s1941_s30  ;;  %p1947_p5 = scmp.lt.s32.totalorder %s1941_s30, %s1941_s30 }
   0xd   :  { %p1948_p6 = por %p1947_p5, %p1946_p4 }
   0xf   :  { %p1949_p7 = pnand %p1948_p6, %p1942_p3 }
  0x11   :  { %1952 = shalt.err (!%p1949_p7)
}
  0x12   :  { %37 = dma.hbm_to_vmem [thread:$0]  %s2391_s3, 32, %s35_s22, [#allocation3]  }
  0x13   :  { %2041 = dma.done.wait [#allocation3], 32  }
  0x14   :  { %2042 = vsyncadd [#allocation3], 4294967264  ;;  %vm69_vm0 = vcmask 261120   ;;  %v61_v0 = vld [vmem:[%s2393_s5] sm:$0xff]  ;;  %v62_v1 = vld [vmem:[%s2393_s5 + $0x8] sm:$0xff]  ;;  %v2050_v26 = vmov 0.0|0.0  }
  0x15   :  { %v63_v2 = vld [vmem:[%s2393_s5 + $0x10] sm:$0xff]  ;;  %v1839_v3 = vpack.c.bf16 %v62_v1, %v61_v0  ;;  %v64_v4 = vld [vmem:[%s2393_s5 + $0x18] sm:$0xff]  ;;  %v2151_v5 = vld [vmem:[%s2388_s0] sm:$0xff]  ;;  %vm2051_vm2 = vmmov 0   ;;  %v2052_v27 = vmov 0.0   ;;  %vm619_vm3 = vcmask 64512  }
  0x16   :  { %v1843_v6 = vpack.c.bf16 %v64_v4, %v63_v2  ;;  %1739 = vmatprep.mubr.msk.f32.mxu0 %vm69_vm0, %v2151_v5  ;;  %v57_v7 = vld [vmem:[%s2392_s4] sm:$0xff]  ;;  %v58_v8 = vld [vmem:[%s2392_s4 + $0x8] sm:$0xff]  ;;  %v67_v13 = vld [vmem:[%s2394_s6 + $0x10] sm:$0xff]  ;;  %vm790_vm4 = vcmask 130048   ;;  %vm994_vm5 = vcmask 130112   ;;  %vm1005_vm6 = vcmask 1041409  }
  0x17   :  { %1840 = vmatprep.subr.bf16.mxu0 %v1839_v3  ;;  %v2164_v9 = vld [vmem:[%s2389_s1] sm:$0xff]  ;;  %v1855_v11 = vpack.c.bf16 %v58_v8, %v57_v7  ;;  %v66_v12 = vld [vmem:[%s2394_s6 + $0x8] sm:$0xff]  ;;  %v68_v14 = vld [vmem:[%s2394_s6 + $0x18] sm:$0xff]  ;;  %vm1008_vm7 = vcmask 123904   ;;  %vm1102_vm8 = vcmask 58368   ;;  %s2056_s30 = smov [#allocation5]  }
  0x18   :  { %1842 = vmatpush3.bf16.msra.mxu0 %v1839_v3  ;;  %v65_v10 = vld [vmem:[%s2394_s6] sm:$0xff]  ;;  %1753 = vmatprep.mubr.msk.f32.mxu1 %vm69_vm0, %v2164_v9  ;;  %v59_v15 = vld [vmem:[%s2392_s4 + $0x10] sm:$0xff]  ;;  %v60_v16 = vld [vmem:[%s2392_s4 + $0x18] sm:$0xff]  ;;  %v1851_v18 = vpack.c.bf16 %v68_v14, %v67_v13  ;;  %s1595_s13 = sshll.u32 %s2056_s30, 4  ;;  %s1596_s13 = int_to_ptr.vmem [resolvable:$true] %s1595_s13 }
  0x19   :  { %1844 = vmatprep.subr.bf16.mxu0 %v1843_v6  ;;  %v1847_v17 = vpack.c.bf16 %v66_v12, %v65_v10  ;;  %v52_v19 = vld [vmem:[%s2388_s0 + $0x8] sm:$0xff]  ;;  %v53_v20 = vld [vmem:[%s2388_s0 + $0x10] sm:$0xff]  ;;  %v1859_v21 = vpack.c.bf16 %v60_v16, %v59_v15  ;;  %v54_v22 = vld [vmem:[%s2388_s0 + $0x18] sm:$0xff] }
  0x1a   :  { %v2203_v23 = vld [vmem:[%s2389_s1 + $0x8] sm:$0xff]  ;;  %v1864_v24 = vpack.c.bf16 %v52_v19, %v2151_v5  ;;  %v1868_v25 = vpack.c.bf16 %v54_v22, %v53_v20  ;;  %vm1865_vm1 = vmpackc.low %vm69_vm0, %vm69_vm0  ;;  %v1671_v60 = vld [vmem:[%s2395_s7] ss:$0 sm:$0xff] }
  0x1b   :  { %1848 = vmatprep.subr.bf16.mxu1 %v1847_v17  ;;  %v1672_v4 = vld [vmem:[%s2396_s8] ss:$0 sm:$0xff] }
  0x1c   :  { %1846 = vmatpush3.bf16.msra.mxu0 %v1843_v6  ;;  %1850 = vmatpush3.bf16.msra.mxu1 %v1847_v17  ;;  %v983_v17 = vlaneseq }
  0x1d   :  { %1856 = vmatprep.subr.bf16.mxu0 %v1855_v11  ;;  %1852 = vmatprep.subr.bf16.mxu1 %v1851_v18 }
  0x1f   :  { %1740 = vmatmul.mubr.msk.f32.vlgmr.msra.gmra.mrb[0].mxu0 %vm69_vm0, %v52_v19 }
  0x20   :  { %1858 = vmatpush3.bf16.msra.mxu0 %v1855_v11  ;;  %1742 = vmatprep.mubr.msk.f32.mxu0 %vm69_vm0, %v53_v20 }
  0x21   :  { %1860 = vmatprep.subr.bf16.mxu0 %v1859_v21  ;;  %1854 = vmatpush3.bf16.msra.mxu1 %v1851_v18  ;;  %v984_v18 = vand.u32 127, %v983_v17 }
  0x22   :  { %1863 = vmatprep.subr.bf16.mxu1 %v2050_v26 }
  0x23   :  { %1743 = vmatmul.mubr.msk.f32.gmra.mrb[2].mxu0 %vm69_vm0, %v54_v22 }
  0x24   :  { %1862 = vmatpush3.bf16.msra.mxu0 %v1859_v21  ;;  %1764 = vmatprep.mubr.msk.f32.mxu0 %vm69_vm0, %v2164_v9  ;;  %v2260_v21 = vshrl.u32 %v983_v17, 7 }
  0x25   :  { %1754 = vmatmul.mubr.msk.f32.vlgmr.msra.gmra.mrb[0].mxu1 %vm69_vm0, %v2203_v23  ;;  %1867 = vmatprep.subr.bf16.mxu0 %v2050_v26 }
  0x26   :  { %1771 = vmatprep.mubr.msk.f32.mxu1 %vm2051_vm2, %v2052_v27 }
  0x27   :  { %1765 = vmatmul.mubr.msk.f32.vlgmr.msra.gmra.mrb[4].mxu0 %vm69_vm0, %v2203_v23 }
  0x28   :  { %1778 = vmatprep.mubr.msk.f32.mxu0 %vm2051_vm2, %v2052_v27 }
  0x2a   :  { %1866 = vmatpush3.bf16.xpose.msk.msra.mxu1 %vm1865_vm1, %v1864_v24 }
  0x2d   :  { %1870 = vmatpush3.bf16.xpose.msk.msra.mxu0 %vm1865_vm1, %v1868_v25 }
  0xf2   :  { %v1741_v28 = vpop.f32.mrb[0].mxu0 }
  0xf3   :  { %v148_v29 = vpop.f32.mrb[1].mxu0 }
  0xf4   :  { %v1872_v30 = vpack.c.bf16 %v1741_v28, %v148_v29 }
  0xf6   :  { %v1744_v31 = vpop.f32.mrb[2].mxu0 }
  0xf7   :  { %v158_v32 = vpop.f32.mrb[3].mxu0 }
  0xf8   :  { %v1875_v33 = vpack.c.bf16 %v1744_v31, %v158_v32  ;;  %v2216_v34 = vpop.f32.mrb[0].mxu1 }
  0xf9   :  { %v239_v35 = vpop.f32.mrb[1].mxu1 }
  0xfa   :  { %v1766_v36 = vpop.f32.mrb[4].mxu0  ;;  %1791 = vmatprep.subr.mxu0 %v239_v35 }
  0xfb   :  { %v314_v37 = vpop.f32.mrb[5].mxu0  ;;  %1779 = vmatmul.mubr.msk.f32.vlgmr.msra.gmra.mrb[6].mxu0 %vm69_vm0, %v1766_v36 }
  0xfc   :  { %1772 = vmatmul.mubr.msk.f32.vlgmr.msra.gmra.mrb[2].mxu1 %vm69_vm0, %v314_v37  ;;  %1781 = vmatprep.subr.msk.mxu1 %vm69_vm0, %v314_v37 }
  0xfd   :  { %1782 = vmatpush3.xpose.msk.msra.mxu1 %vm69_vm0, %v314_v37  ;;  %1783 = vmatprep.mubr.msk.f32.mxu1 %vm69_vm0, %v2151_v5 }
  0xfe   :  { %1786 = vmatprep.subr.msk.mxu1 %vm69_vm0, %v1766_v36  ;;  %1792 = vmatpush3.msra.mxu0 %v239_v35 }
  0xff   :  { %1871 = vmatprep.subr.bf16.mxu0 %v2050_v26 }
 0x100   :  { %1784 = vmatmul.mubr.msk.f32.vlgmr.msra.gmra.mrb[4].mxu1 %vm69_vm0, %v52_v19 }
 0x101   :  { %1787 = vmatpush3.xpose.msk.msra.mxu1 %vm69_vm0, %v1766_v36  ;;  %1788 = vmatprep.mubr.msk.f32.mxu1 %vm69_vm0, %v53_v20  ;;  %v989_v20 = vadd.s32 4294967288, %v984_v18 }
 0x102   :  { %1796 = vmatprep.subr.mxu1 %v2216_v34 }
 0x104   :  { %1789 = vmatmul.mubr.msk.f32.vlgmr.msra.gmra.mrb[6].mxu1 %vm69_vm0, %v54_v22  ;;  %v2263_v22 = vsub.s32 %v989_v20, %v2260_v21 }
 0x105   :  { %1797 = vmatpush3.msra.mxu1 %v2216_v34 }
 0x106   :  { %1874 = vmatprep.subr.bf16.mxu1 %v2050_v26 }
 0x1ce   :  { %v465_v38 = vpop.f32.mrb[6].mxu0 }
 0x1cf   :  { %v392_v39 = vpop.f32.mrb[2].mxu1  ;;  %v1780_v40 = vpop.f32.mrb[7].mxu0 }
 0x1d0   :  { %v1773_v41 = vpop.f32.mrb[3].mxu1 }
 0x1d3   :  { %v1785_v42 = vpop.f32.mrb[4].mxu1 }
 0x1d4   :  { %v535_v43 = vpop.f32.mrb[5].mxu1 }
 0x1d5   :  { %1793 = vmatprep.mubr.msk.f32.mxu0 %vm619_vm3, %v535_v43  ;;  %v2053_v43 = vmov 0  }
 0x1d6   :  { %1794 = vmatmul.mubr.msk.f32.vlgmr.msra.gmra.mrb[8].mxu0 %vm619_vm3, %v1785_v42  ;;  %1894 = vset.pattern.permute.xlu1 %v2053_v43 }
 0x1d7   :  { %1873 = vmatpush3.bf16.msra.mxu0 %v1872_v30  ;;  %v1790_v44 = vpop.f32.mrb[6].mxu1  ;;  %1805 = vmatprep.mubr.msk.f32.mxu0 %vm2051_vm2, %v2052_v27 }
 0x1d8   :  { %v610_v45 = vpop.f32.mrb[7].mxu1  ;;  %1877 = vmatprep.subr.bf16.mxu0 %v2050_v26  ;;  %1893 = vset.pattern.permute.xlu0 %v2053_v43 }
 0x1d9   :  { %1798 = vmatprep.mubr.msk.f32.mxu1 %vm619_vm3, %v610_v45  ;;  %v2284_v45 = vsub.s32 1, %v2260_v21 }
 0x1da   :  { %1799 = vmatmul.mubr.msk.f32.vlgmr.msra.gmra.mrb[8].mxu1 %vm619_vm3, %v1790_v44  ;;  %1806 = vmatmul.mubr.msk.f32.vlgmr.msra.gmra.mrb[10].mxu0 %vm790_vm4, %v392_v39  ;;  %v2281_v44 = vsub.s32 0, %v2260_v21 }
 0x1db   :  { %1876 = vmatpush3.bf16.msra.mxu1 %v1875_v33  ;;  %1812 = vmatprep.mubr.msk.f32.mxu1 %vm2051_vm2, %v2052_v27 }
 0x1dc   :  { %1879 = vmatpush3.bf16.msra.mxu0 %v1864_v24  ;;  %1880 = vmatprep.subr.bf16.mxu1 %v2050_v26  ;;  %v2266_v26 = vsub.s32 %v984_v18, %v2260_v21 }
 0x1dd   :  { %1819 = vmatprep.mubr.msk.f32.mxu0 %vm2051_vm2, %v2052_v27  ;;  %1829 = vmatprep.subr.mxu0 %v2052_v27 }
 0x1de   :  { %1813 = vmatmul.mubr.msk.f32.vlgmr.msra.gmra.mrb[10].mxu1 %vm790_vm4, %v465_v38 }
 0x1df   :  { %1882 = vmatpush3.bf16.msra.mxu1 %v1868_v25  ;;  %1826 = vmatprep.mubr.msk.f32.mxu1 %vm2051_vm2, %v2052_v27 }
 0x1e0   :  { %1834 = vmatprep.subr.mxu1 %v2052_v27 }
 0x2a9   :  { %v1795_v46 = vpop.f32.mrb[8].mxu0 }
 0x2aa   :  { %v783_v47 = vadd.f32 %v1795_v46, %v1741_v28  ;;  %v692_v48 = vpop.f32.mrb[9].mxu0 }
 0x2ab   :  { %v782_v49 = vadd.f32 %v692_v48, %v148_v29 }
 0x2ac   :  { %1895 = vtanh.f32 %v783_v47 }
 0x2ad   :  { %1897 = vtanh.f32 %v782_v49  ;;  %v1800_v50 = vpop.f32.mrb[8].mxu1  ;;  %v860_v51 = vpop.f32.mrb[10].mxu0 }
 0x2ae   :  { %v785_v52 = vadd.f32 %v1800_v50, %v1744_v31  ;;  %v937_v53 = vadd.f32 %v860_v51, %v239_v35  ;;  %v773_v54 = vpop.f32.mrb[9].mxu1  ;;  %v1807_v55 = vpop.f32.mrb[11].mxu0 }
 0x2af   :  { %v784_v56 = vadd.f32 %v773_v54, %v158_v32 }
 0x2b0   :  { %1899 = vtanh.f32 %v785_v52 }
 0x2b1   :  { %1901 = vtanh.f32 %v937_v53  ;;  %v933_v57 = vpop.f32.mrb[10].mxu1 }
 0x2b2   :  { %1903 = vtanh.f32 %v784_v56  ;;  %v938_v58 = vadd.f32 %v2216_v34, %v933_v57  ;;  %v1814_v59 = vpop.f32.mrb[11].mxu1 }
 0x2b4   :  { %1905 = vtanh.f32 %v938_v58 }
 0x2b6   :  { %v1896_v61 = vpop.eup %1895 }
 0x2b7   :  { %v1898_v62 = vpop.eup %1897  ;;  %v950_v2 = vmul.f32 %v1896_v61, %v1671_v60 }
 0x2b8   :  { %v949_v63 = vmul.f32 %v1898_v62, %v1671_v60 }
 0x2b9   :  { %v956_v7 = vsel %vm790_vm4, %v950_v2, 0.0 }
 0x2ba   :  { %v1900_v0 = vpop.eup %1899  ;;  %v953_v1 = vsel %vm790_vm4, %v949_v63, 0.0 }
 0x2bb   :  { %v1902_v3 = vpop.eup %1901  ;;  %954 = vadd.xlane.f32.xlu0 %v953_v1  ;;  %v952_v11 = vmul.f32 %v1900_v0, %v1671_v60 }
 0x2bc   :  { %v1904_v5 = vpop.eup %1903  ;;  %v971_v8 = vmul.f32 %v1902_v3, %v1672_v4 }
 0x2bd   :  { %v951_v6 = vmul.f32 %v1904_v5, %v1671_v60  ;;  %v962_v14 = vsel %vm790_vm4, %v952_v11, 0.0 }
 0x2be   :  { %v1906_v12 = vpop.eup %1905  ;;  %v973_v13 = vsel %vm790_vm4, %v971_v8, 0.0 }
 0x2bf   :  { %957 = vadd.xlane.f32.xlu0 %v956_v7  ;;  %v959_v10 = vsel %vm790_vm4, %v951_v6, 0.0  ;;  %v972_v15 = vmul.f32 %v1906_v12, %v1672_v4 }
 0x2c0   :  { %960 = vadd.xlane.f32.xlu1 %v959_v10 }
 0x2c1   :  { %v976_v16 = vsel %vm790_vm4, %v972_v15, 0.0 }
 0x2c3   :  { %974 = vadd.xlane.f32.xlu0 %v973_v13 }
 0x2c4   :  { %963 = vadd.xlane.f32.xlu1 %v962_v14 }
 0x2c8   :  { %977 = vadd.xlane.f32.xlu1 %v976_v16 }
 0x348   :  { %v955_v19 = vpop.xlane.xlu0 %954 }
 0x349   :  { %v988_v30 = vrot.slane %v955_v19, %v2266_v26 }
 0x34c   :  { %v958_v24 = vpop.xlane.xlu0 %957 }
 0x34d   :  { %v961_v25 = vpop.xlane.xlu1 %960  ;;  %v993_v28 = vrot.slane %v958_v24, %v2263_v22 }
 0x34e   :  { %v999_v31 = vrot.slane %v961_v25, %v2266_v26 }
 0x34f   :  { %v995_v34 = vsel %vm994_vm5, %v993_v28, %v988_v30 }
 0x350   :  { %v975_v33 = vpop.xlane.xlu0 %974 }
 0x351   :  { %v964_v29 = vpop.xlane.xlu1 %963  ;;  %v1095_v38 = vrot.slane %v975_v33, %v2266_v26 }
 0x352   :  { %v1003_v32 = vrot.slane %v964_v29, %v2263_v22 }
 0x354   :  { %v1004_v35 = vsel %vm994_vm5, %v1003_v32, %v999_v31 }
 0x355   :  { %v978_v36 = vpop.xlane.xlu1 %977  ;;  %v1006_v37 = vsel %vm1005_vm6, %v1004_v35, %v995_v34 }
 0x356   :  { %v1099_v39 = vrot.slane %v978_v36, %v2266_v26  ;;  %v1009_v40 = vsel %vm1008_vm7, %v1006_v37, -inf }
 0x357   :  { %1010 = vmax.xlane.f32.xlu0 %v1009_v40 }
 0x358   :  { %v1100_v41 = vsel %vm1005_vm6, %v1099_v39, %v1095_v38 }
 0x359   :  { %v1103_v42 = vsel %vm1102_vm8, %v1100_v41, -inf }
 0x35a   :  { %1104 = vmax.xlane.f32.xlu1 %v1103_v42 }
 0x3e4   :  { %v1011_v46 = vpop.xlane.xlu0 %1010 }
 0x3e5   :  { %v1016_v47 = vrot.slane %v1011_v46, %v2281_v44  ;;  %v1020_v48 = vrot.slane %v1011_v46, %v2284_v45 }
 0x3e7   :  { %v1023_v49 = vsub.f32 %v955_v19, %v1016_v47  ;;  %v1024_v50 = vsub.f32 %v958_v24, %v1016_v47  ;;  %v1025_v51 = vsub.f32 %v961_v25, %v1020_v48  ;;  %v1105_v54 = vpop.xlane.xlu1 %1104  ;;  %v1026_v55 = vsub.f32 %v964_v29, %v1020_v48 }
 0x3e8   :  { %v1110_v57 = vrot.slane %v1105_v54, %v2281_v44  ;;  %v1114_v59 = vrot.slane %v1105_v54, %v2284_v45  ;;  %v1208_v54 = vld [vmem:[#allocation2] sm:$0x3] }
 0x3e9   :  { %v1027_v52 = vmul.f32 1.442695, %v1023_v49  ;;  %v1029_v53 = vmul.f32 1.442695, %v1024_v50  ;;  %v1031_v56 = vmul.f32 1.442695, %v1025_v51 }
 0x3ea   :  { %v1033_v58 = vmul.f32 1.442695, %v1026_v55  ;;  %v1117_v60 = vsub.f32 %v975_v33, %v1110_v57  ;;  %v1118_v61 = vsub.f32 %v978_v36, %v1114_v59  ;;  %vm1209_vm10 = vcmp.eq.f32.partialorder %v1208_v54, 0.0 }
 0x3eb   :  { %1907 = vpow2.f32 %v1027_v52 }
 0x3ec   :  { %1909 = vpow2.f32 %v1029_v53  ;;  %v1119_v62 = vmul.f32 1.442695, %v1117_v60  ;;  %v1121_v1 = vmul.f32 1.442695, %v1118_v61 }
 0x3ed   :  { %1911 = vpow2.f32 %v1031_v56 }
 0x3ee   :  { %1913 = vpow2.f32 %v1033_v58 }
 0x3ef   :  { %1915 = vpow2.f32 %v1119_v62 }
 0x3f0   :  { %1917 = vpow2.f32 %v1121_v1 }
 0x3f5   :  { %v1908_v63 = vpop.eup %1907 }
 0x3f6   :  { %v1910_v0 = vpop.eup %1909  ;;  %1040 = vperm.xlu0 %1893, %v1908_v63  }
 0x3f7   :  { %1043 = vperm.xlu1 %1894, %v1910_v0   ;;  %v1912_v2 = vpop.eup %1911 }
 0x3f8   :  { %v1914_v3 = vpop.eup %1913 }
 0x3f9   :  { %v1916_v4 = vpop.eup %1915 }
 0x3fa   :  { %v1918_v5 = vpop.eup %1917 }
 0x3fb   :  { %1046 = vperm.xlu1 %1894, %v1912_v2  }
 0x3ff   :  { %1049 = vperm.xlu1 %1894, %v1914_v3  }
 0x403   :  { %1126 = vperm.xlu1 %1894, %v1916_v4  }
 0x407   :  { %1129 = vperm.xlu1 %1894, %v1918_v5  }
 0x475   :  { %v1041_v7 = vpop.permute.xlu0 %1040 }
 0x476   :  { %v1044_v6 = vpop.permute.xlu1 %1043  ;;  %v1054_v10 = vrot.slane %v1041_v7, %v2266_v26 }
 0x477   :  { %v1058_v11 = vrot.slane %v1044_v6, %v2263_v22 }
 0x479   :  { %v1059_v15 = vsel %vm994_vm5, %v1058_v11, %v1054_v10 }
 0x47a   :  { %v1047_v8 = vpop.permute.xlu1 %1046 }
 0x47b   :  { %v1063_v13 = vrot.slane %v1047_v8, %v2266_v26 }
 0x47e   :  { %v1050_v12 = vpop.permute.xlu1 %1049 }
 0x47f   :  { %v1067_v14 = vrot.slane %v1050_v12, %v2263_v22  ;;  %v2054_v12 = vmov 1966171168  }
 0x481   :  { %v1068_v16 = vsel %vm994_vm5, %v1067_v14, %v1063_v13  ;;  %v1244_v13 = vunpack.c.l.s4 %v2054_v12 }
 0x482   :  { %v1127_v17 = vpop.permute.xlu1 %1126  ;;  %v1069_v18 = vsel %vm1005_vm6, %v1068_v16, %v1059_v15 }
 0x483   :  { %v1071_v19 = vsel %vm1008_vm7, %v1069_v18, 0.0  ;;  %v1134_v24 = vrot.slane %v1127_v17, %v2266_v26  ;;  %v1245_v15 = vunpack.c.0.s8 %v1244_v13 }
 0x484   :  { %1072 = vadd.xlane.f32.xlu1 %v1071_v19 }
 0x485   :  { %v1248_v16 = vsub.s32 %v1245_v15, %v2260_v21 }
 0x486   :  { %v1130_v20 = vpop.permute.xlu1 %1129 }
 0x487   :  { %v1138_v25 = vrot.slane %v1130_v20, %v2266_v26 }
 0x489   :  { %v1139_v28 = vsel %vm1005_vm6, %v1138_v25, %v1134_v24 }
 0x48a   :  { %v1141_v29 = vsel %vm1102_vm8, %v1139_v28, 0.0 }
 0x48b   :  { %1142 = vadd.xlane.f32.xlu0 %v1141_v29 }
 0x511   :  { %v1073_v30 = vpop.xlane.xlu1 %1072 }
 0x512   :  { %1919 = vrcp.f32 %v1073_v30 }
 0x518   :  { %v1143_v31 = vpop.xlane.xlu0 %1142 }
 0x519   :  { %1921 = vrcp.f32 %v1143_v31 }
 0x51c   :  { %v1920_v32 = vpop.eup %1919 }
 0x51d   :  { %v1079_v33 = vrot.slane %v1920_v32, %v2281_v44  ;;  %v1083_v36 = vrot.slane %v1920_v32, %v2284_v45 }
 0x51f   :  { %v1087_v34 = vmul.f32 %v1910_v0, %v1079_v33  ;;  %v1086_v35 = vmul.f32 %v1908_v63, %v1079_v33  ;;  %v1088_v38 = vmul.f32 %v1912_v2, %v1083_v36  ;;  %v1089_v41 = vmul.f32 %v1914_v3, %v1083_v36 }
 0x521   :  { %1168 = vperm.xlu0 %1893, %v1087_v34   ;;  %1165 = vperm.xlu1 %1894, %v1086_v35  }
 0x523   :  { %v1922_v37 = vpop.eup %1921 }
 0x524   :  { %v1153_v39 = vrot.slane %v1922_v37, %v2284_v45  ;;  %v1149_v42 = vrot.slane %v1922_v37, %v2281_v44  ;;  %v1158_v45 = vld [vmem:[%s2390_s2] sm:$0x3]  ;;  %s2055_s2 = smov [#allocation6]  }
 0x525   :  { %1171 = vperm.xlu1 %1894, %v1088_v38   ;;  %vm1159_vm9 = vcmp.eq.f32.partialorder %v1158_v45, 0.0  ;;  %s1605_s29 = sshll.u32 %s2055_s2, 4  ;;  %s1606_s29 = int_to_ptr.vmem [resolvable:$true] %s1605_s29 }
 0x526   :  { %v1157_v40 = vmul.f32 %v1918_v5, %v1153_v39  ;;  %v1156_v43 = vmul.f32 %v1916_v4, %v1149_v42  ;;  %s1953_s14 = scalar_lea.vmem %s1606_s29, 32  ;;  %p1958_p9 = scmp.lt.s32.totalorder %s1606_s29, %s1606_s29 }
 0x527   :  { %p1954_p8 = scmp.ne.s32.totalorder %s1606_s29, %s1953_s14  ;;  %p1959_p10 = scmp.lt.s32.totalorder %s1953_s14, %s1953_s14 }
 0x528   :  { %1216 = vperm.xlu0 %1893, %v1157_v40  }
 0x529   :  { %1174 = vperm.xlu1 %1894, %v1089_v41   ;;  %p1960_p11 = por %p1959_p10, %p1958_p9 }
 0x52b   :  { %p1961_p12 = pnand %p1960_p11, %p1954_p8 }
 0x52d   :  { %1213 = vperm.xlu1 %1894, %v1156_v43  }
 0x5a0   :  { %v1166_v46 = vpop.permute.xlu1 %1165  ;;  %v1169_v47 = vpop.permute.xlu0 %1168 }
 0x5a1   :  { %v1183_v49 = vrot.slane %v1169_v47, %v2263_v22  ;;  %v1179_v50 = vrot.slane %v1166_v46, %v2266_v26 }
 0x5a3   :  { %v1184_v55 = vsel %vm994_vm5, %v1183_v49, %v1179_v50 }
 0x5a4   :  { %v1172_v48 = vpop.permute.xlu1 %1171 }
 0x5a5   :  { %v1188_v52 = vrot.slane %v1172_v48, %v2266_v26 }
 0x5a7   :  { %v1217_v53 = vpop.permute.xlu0 %1216 }
 0x5a8   :  { %v1175_v51 = vpop.permute.xlu1 %1174  ;;  %v1225_v59 = vrot.slane %v1217_v53, %v2266_v26 }
 0x5a9   :  { %v1192_v44 = vrot.slane %v1175_v51, %v2263_v22 }
 0x5ab   :  { %v1193_v56 = vsel %vm994_vm5, %v1192_v44, %v1188_v52 }
 0x5ac   :  { %v1214_v57 = vpop.permute.xlu1 %1213  ;;  %v1194_v58 = vsel %vm1005_vm6, %v1193_v56, %v1184_v55 }
 0x5ad   :  { %v1221_v60 = vrot.slane %v1214_v57, %v2266_v26  ;;  %v1196_v61 = vsel %vm1159_vm9, -inf, %v1194_v58 }
 0x5ae   :  { %v1197_v62 = vsel %vm1008_vm7, %v1196_v61, -inf }
 0x5af   :  { %1198 = vmax.xlane.f32.xlu1 %v1197_v62  ;;  %v1226_v22 = vsel %vm1005_vm6, %v1225_v59, %v1221_v60 }
 0x5b0   :  { %v1228_v63 = vsel %vm1209_vm10, -inf, %v1226_v22 }
 0x5b1   :  { %v1229_v0 = vsel %vm1102_vm8, %v1228_v63, -inf }
 0x5b2   :  { %1230 = vmax.xlane.f32.xlu0 %v1229_v0 }
 0x63c   :  { %v1199_v1 = vpop.xlane.xlu1 %1198 }
 0x63d   :  { %v1200_v2 = vsub.f32 %v1196_v61, %v1199_v1 }
 0x63f   :  { %v1201_v3 = vmul.f32 1.442695, %v1200_v2  ;;  %v1231_v4 = vpop.xlane.xlu0 %1230 }
 0x640   :  { %v1232_v5 = vsub.f32 %v1228_v63, %v1231_v4 }
 0x641   :  { %1923 = vpow2.f32 %v1201_v3 }
 0x642   :  { %v1233_v6 = vmul.f32 1.442695, %v1232_v5 }
 0x644   :  { %1925 = vpow2.f32 %v1233_v6 }
 0x64b   :  { %v1924_v26 = vpop.eup %1923 }
 0x64c   :  { %v1203_v7 = vsel %vm1008_vm7, %v1924_v26, 0.0 }
 0x64d   :  { %1204 = vadd.xlane.f32.xlu0 %v1203_v7 }
 0x64e   :  { %v1926_v8 = vpop.eup %1925 }
 0x64f   :  { %v1235_v10 = vsel %vm1102_vm8, %v1926_v8, 0.0 }
 0x650   :  { %1236 = vadd.xlane.f32.xlu1 %v1235_v10 }
 0x6da   :  { %v1205_v11 = vpop.xlane.xlu0 %1204 }
 0x6db   :  { %1927 = vrcp.f32 %v1205_v11 }
 0x6dd   :  { %v1237_v14 = vpop.xlane.xlu1 %1236 }
 0x6de   :  { %1929 = vrcp.f32 %v1237_v14 }
 0x6e5   :  { %v1928_v17 = vpop.eup %1927 }
 0x6e6   :  { %v1207_v18 = vmul.f32 %v1928_v17, %v1924_v26 }
 0x6e8   :  { %v1930_v19 = vpop.eup %1929  ;;  %v1249_v20 = vrot.slane %v1207_v18, %v1248_v16  ;;  %1240 = vst.msk [vmem:[#allocation5] sm:$0x3] %vm1008_vm7, %v1207_v18 }
 0x6e9   :  { %v1239_v24 = vmul.f32 %v1930_v19, %v1926_v8 }
 0x6ea   :  { %v1257_v25 = vrot.slane %v1249_v20, %v1248_v16  ;;  %v1250_v28 = vcombine.high %v1249_v20, %v1249_v20 }
 0x6eb   :  { %v1416_v29 = vrot.slane %v1239_v24, %v1248_v16  ;;  %1241 = vst.msk [vmem:[#allocation6] sm:$0x3] %vm1102_vm8, %v1239_v24 }
 0x6ec   :  { %1820 = vmatmul.mubr.msk.f32.vlgmr.msra.gmra.mrb[12].mxu0 %vm790_vm4, %v1257_v25  ;;  %v1264_v30 = vrot.slane %v1250_v28, %v1248_v16 }
 0x6ed   :  { %1830 = vmatpush3.msra.mxu0 %v2164_v9  ;;  %1831 = vmatprep.mubr.msk.f32.mxu0 %vm2051_vm2, %v2052_v27  ;;  %v1424_v21 = vrot.slane %v1416_v29, %v1248_v16  ;;  %v1417_v31 = vcombine.high %v1416_v29, %v1416_v29 }
 0x6ee   :  { %1827 = vmatmul.mubr.msk.f32.vlgmr.msra.gmra.mrb[12].mxu1 %vm790_vm4, %v1264_v30 }
 0x6ef   :  { %1835 = vmatpush3.msra.mxu1 %v2203_v23  ;;  %1836 = vmatprep.mubr.msk.f32.mxu1 %vm2051_vm2, %v2052_v27  ;;  %v1431_v32 = vrot.slane %v1417_v31, %v1248_v16 }
 0x6f0   :  { %1832 = vmatmul.mubr.msk.f32.vlgmr.msra.gmra.mrb[14].mxu0 %vm619_vm3, %v1424_v21 }
 0x6f2   :  { %1837 = vmatmul.mubr.msk.f32.vlgmr.msra.gmra.mrb[14].mxu1 %vm619_vm3, %v1431_v32 }
 0x6f3   :  { %1964 = shalt.err (!%p1961_p12)
}
 0x6f4   :  { %s1965_s17 = scalar_lea.hbm %s2398_s10, 32 }
 0x6f5   :  { %p1966_p13 = scmp.ne.s32.totalorder %s2398_s10, %s1965_s17  ;;  %p1969_p0 = scmp.lt.u32.totalorder %s1965_s17, %s2398_s10 }
 0x6f7   :  { %p1971_p1 = pnand %p1969_p0, %p1966_p13 }
 0x6f9   :  { %1974 = shalt.err (!%p1971_p1)
}
 0x6fa   :  { %1608 = dma.vmem_to_hbm [thread:$0]  %s1606_s29, 32, %s2398_s10, [#allocation7]  }
 0x6fb   :  { %s1975_s22 = scalar_lea.vmem %s1596_s13, 32  ;;  %p1980_p3 = scmp.lt.s32.totalorder %s1596_s13, %s1596_s13 }
 0x6fc   :  { %p1976_p2 = scmp.ne.s32.totalorder %s1596_s13, %s1975_s22  ;;  %p1981_p4 = scmp.lt.s32.totalorder %s1975_s22, %s1975_s22 }
 0x6fe   :  { %p1982_p5 = por %p1981_p4, %p1980_p3 }
 0x700   :  { %p1983_p6 = pnand %p1982_p5, %p1976_p2 }
 0x702   :  { %1986 = shalt.err (!%p1983_p6)
}
 0x703   :  { %s1987_s4 = scalar_lea.hbm %s2397_s9, 32 }
 0x704   :  { %p1988_p7 = scmp.ne.s32.totalorder %s2397_s9, %s1987_s4  ;;  %p1991_p8 = scmp.lt.u32.totalorder %s1987_s4, %s2397_s9 }
 0x706   :  { %p1993_p9 = pnand %p1991_p8, %p1988_p7 }
 0x708   :  { %1996 = shalt.err (!%p1993_p9)
}
 0x709   :  { %1598 = dma.vmem_to_hbm [thread:$0]  %s1596_s13, 32, %s2397_s9, [#allocation4]   ;;  %vm1581_vm11 = vcmask 254976  }
 0x70a   :  { %s2057_s5 = smov [#allocation8]   ;;  %s2058_s7 = smov [#allocation9]  }
 0x70b   :  { %s1615_s28 = sshll.u32 %s2057_s5, 4  ;;  %s1625_s8 = sshll.u32 %s2058_s7, 4  ;;  %s1616_s28 = int_to_ptr.vmem [resolvable:$true] %s1615_s28  ;;  %s1626_s8 = int_to_ptr.vmem [resolvable:$true] %s1625_s8 }
 0x70c   :  { %s1997_s9 = scalar_lea.vmem %s1616_s28, 32  ;;  %p2002_p11 = scmp.lt.s32.totalorder %s1616_s28, %s1616_s28 }
 0x70d   :  { %p1998_p10 = scmp.ne.s32.totalorder %s1616_s28, %s1997_s9  ;;  %p2003_p12 = scmp.lt.s32.totalorder %s1997_s9, %s1997_s9 }
 0x70f   :  { %p2004_p13 = por %p2003_p12, %p2002_p11 }
 0x711   :  { %p2005_p0 = pnand %p2004_p13, %p1998_p10 }
 0x7bf   :  { %v1333_v9 = vpop.f32.mrb[12].mxu0 }
 0x7c0   :  { %v1821_v23 = vpop.f32.mrb[13].mxu0 }
 0x7c1   :  { %v1405_v27 = vpop.f32.mrb[12].mxu1 }
 0x7c2   :  { %v1578_v33 = vrot.slane %v1405_v27, 7  ;;  %v1828_v34 = vpop.f32.mrb[13].mxu1 }
 0x7c3   :  { %v1500_v35 = vpop.f32.mrb[14].mxu0 }
 0x7c4   :  { %v1579_v36 = vsel %vm1005_vm6, %v1578_v33, %v1333_v9  ;;  %v1833_v37 = vpop.f32.mrb[15].mxu0 }
 0x7c5   :  { %v1572_v38 = vpop.f32.mrb[14].mxu1  ;;  %1582 = vst.msk [vmem:[#allocation8] sm:$0x3] %vm1581_vm11, %v1579_v36 }
 0x7c6   :  { %v1585_v39 = vrot.slane %v1572_v38, 7  ;;  %v1838_v40 = vpop.f32.mrb[15].mxu1 }
 0x7c7   :  { %2008 = shalt.err (!%p2005_p0)
}
 0x7c8   :  { %s2009_s30 = scalar_lea.hbm %s2399_s11, 32 }
 0x7c9   :  { %p2010_p1 = scmp.ne.s32.totalorder %s2399_s11, %s2009_s30  ;;  %p2013_p2 = scmp.lt.u32.totalorder %s2009_s30, %s2399_s11 }
 0x7cb   :  { %p2015_p3 = pnand %p2013_p2, %p2010_p1 }
 0x7cd   :  { %2018 = shalt.err (!%p2015_p3)
}
 0x7ce   :  { %1618 = dma.vmem_to_hbm [thread:$0]  %s1616_s28, 32, %s2399_s11, [#allocation7]   ;;  %v1586_v41 = vsel %vm1005_vm6, %v1585_v39, %v1500_v35 }
 0x7cf   :  { %1588 = vst.msk [vmem:[#allocation9] sm:$0x3] %vm1581_vm11, %v1586_v41  ;;  %s2019_s19 = scalar_lea.vmem %s1626_s8, 32  ;;  %p2024_p5 = scmp.lt.s32.totalorder %s1626_s8, %s1626_s8 }
 0x7d0   :  { %p2020_p4 = scmp.ne.s32.totalorder %s1626_s8, %s2019_s19  ;;  %p2025_p6 = scmp.lt.s32.totalorder %s2019_s19, %s2019_s19 }
 0x7d2   :  { %p2026_p7 = por %p2025_p6, %p2024_p5 }
 0x7d4   :  { %p2027_p8 = pnand %p2026_p7, %p2020_p4 }
 0x7d6   :  { %2030 = shalt.err (!%p2027_p8)
}
 0x7d7   :  { %s2031_s23 = scalar_lea.hbm %s2400_s12, 32 }
 0x7d8   :  { %p2032_p9 = scmp.ne.s32.totalorder %s2400_s12, %s2031_s23  ;;  %p2035_p10 = scmp.lt.u32.totalorder %s2031_s23, %s2400_s12 }
 0x7da   :  { %p2037_p11 = pnand %p2035_p10, %p2032_p9 }
 0x7dc   :  { %2040 = shalt.err (!%p2037_p11)
}
 0x7dd   :  { %1628 = dma.vmem_to_hbm [thread:$0]  %s1626_s8, 32, %s2400_s12, [#allocation10]  }
 0x7de   :  { %2043 = dma.done.wait [#allocation4], 32  }
 0x7df   :  { %2044 = vsyncadd [#allocation4], 4294967264 }
 0x7e0   :  { %2045 = dma.done.wait [#allocation7], 64  }
 0x7e1   :  { %2046 = vsyncadd [#allocation7], 4294967232 }
 0x7e2   :  { %2047 = dma.done.wait [#allocation10], 32  }
 0x7e3   :  { %2048 = vsyncadd [#allocation10], 4294967264 }
 0x7e4   :  { %1641 = vsyncpa [#allocation3], 1 }
 0x7e5   :  { %1642 = vsyncpa [#allocation4], 1 }
 0x7e6   :  { %1643 = vsyncpa [#allocation7], 1 }
 0x7e7   :  { %1644 = vsyncpa [#allocation10], 1 }

</bundles_post_ra>
